<compile_context>
chip_gen: v6e
topology: v6e:2x2x1
jax: 0.10.0
libtpu: 0.0.40
codegen_flags: <defaults>
</compile_context>

<pallas_src>
import jax
import jax.numpy as jnp
from jax.experimental import pallas as pl
from jax.experimental.pallas import tpu as pltpu

HIDDEN = 200
HIDDEN_PAD = 256          # 200 -> 256, zero padded (exact)
IN_DIM = 1
OUT_DIM = 1


def _round_up(x, m):
    return ((x + m - 1) // m) * m


def uq_std_kernel(x_ref, w1_ref, b1_ref, w2_ref, b2_ref, o_ref):
    # x_ref : (1, TB)          batch on lanes
    # w1_ref: (HIDDEN_PAD, 1)  fc1 weight column (zero padded)
    # b1_ref: (HIDDEN_PAD, 1)  fc1 bias column   (zero padded)
    # w2_ref: (HIDDEN_PAD, 1)  fc2 weight column (zero padded)
    # b2_ref: (1, 1) in SMEM   fc2 bias scalar
    # o_ref : (1, TB)
    x = x_ref[...]                                              # (1, TB)
    # fc1 (K=1 outer product) + relu, all on the VPU via broadcasting.
    h = jnp.maximum(w1_ref[...] * x + b1_ref[...], 0.0)         # (HPAD, TB)
    # fc2 (N=1 contraction) as a sublane reduction (XLU), + scalar bias.
    z = jnp.sum(h * w2_ref[...], axis=0, keepdims=True) + b2_ref[0, 0]  # (1, TB)
    o_ref[...] = jnp.sqrt(jnp.square(z) + 1e-10).astype(o_ref.dtype)


def uq_net_std_forward(x, w1, b1, w2, b2, *, tile_b=2048):
    """x: (N, 1) float32 -> (N, 1) float32.

    w1: (1, 200), b1: (200,), w2: (200, 1), b2: (1,)  (x @ W + b layout,
    equivalent to PyTorch's x @ W.T + b).
    """
    n = x.shape[0]

    # Tile size: multiple of 256 lanes, clamped so tiny demos stay tiny and
    # large batches get big (>=2048) lane-dense tiles. Working set per step is
    # ~HIDDEN_PAD * tile_b * 4 B (~2 MiB at 2048) -> fits v5e/v6e/v7x VMEM.
    tile_b = max(256, (tile_b // 256) * 256)
    tile_b = min(tile_b, _round_up(max(n, 1), 256))
    n_pad = _round_up(max(n, 1), tile_b)
    grid = n_pad // tile_b

    # Lane-dense input: batch on the last dim, zero-padded tail.
    x_row = jnp.zeros((1, n_pad), jnp.float32).at[0, :n].set(x[:, 0])

    # Weights as (HIDDEN_PAD, 1) columns, zero padded (exact: relu(0)=0,
    # padded w2 rows contribute nothing).
    w1_col = jnp.zeros((HIDDEN_PAD, 1), jnp.float32).at[:HIDDEN, 0].set(
        w1.reshape(HIDDEN))
    b1_col = jnp.zeros((HIDDEN_PAD, 1), jnp.float32).at[:HIDDEN, 0].set(
        b1.reshape(HIDDEN))
    w2_col = jnp.zeros((HIDDEN_PAD, 1), jnp.float32).at[:HIDDEN, 0].set(
        w2.reshape(HIDDEN))
    b2_2d = b2.reshape(1, 1).astype(jnp.float32)

    out_row = pl.pallas_call(
        uq_std_kernel,
        out_shape=jax.ShapeDtypeStruct((1, n_pad), jnp.float32),
        grid_spec=pltpu.PrefetchScalarGridSpec(
            num_scalar_prefetch=0,
            grid=(grid,),
            in_specs=[
                pl.BlockSpec((1, tile_b), lambda i: (0, i)),          # x (lane-dense)
                pl.BlockSpec((HIDDEN_PAD, 1), lambda i: (0, 0)),      # w1
                pl.BlockSpec((HIDDEN_PAD, 1), lambda i: (0, 0)),      # b1
                pl.BlockSpec((HIDDEN_PAD, 1), lambda i: (0, 0)),      # w2
                pl.BlockSpec(memory_space=pltpu.MemorySpace.SMEM),    # b2 scalar
            ],
            out_specs=pl.BlockSpec((1, tile_b), lambda i: (0, i)),    # out (lane-dense)
        ),
        compiler_params=pltpu.CompilerParams(
            dimension_semantics=("parallel",)),
    )(x_row, w1_col, b1_col, w2_col, b2_2d)

    return out_row[0, :n].reshape(n, OUT_DIM)


def init_params(key):
    """Deterministic init mimicking PyTorch nn.Linear defaults
    (uniform in [-1/sqrt(fan_in), 1/sqrt(fan_in)]); fc2 bias set to 15.0."""
    k1, k2, k3 = jax.random.split(key, 3)
    bound1 = 1.0 / jnp.sqrt(float(IN_DIM))
    bound2 = 1.0 / jnp.sqrt(float(HIDDEN))
    w1 = jax.random.uniform(k1, (IN_DIM, HIDDEN), jnp.float32, -bound1, bound1)
    b1 = jax.random.uniform(k2, (HIDDEN,), jnp.float32, -bound1, bound1)
    w2 = jax.random.uniform(k3, (HIDDEN, OUT_DIM), jnp.float32, -bound2, bound2)
    b2 = jnp.array([15.0], dtype=jnp.float32)  # self.fc2.bias = Parameter([15.0])
    return w1, b1, w2, b2


def reference_forward(x, w1, b1, w2, b2):
    h = jnp.maximum(x @ w1 + b1, 0.0)
    z = h @ w2 + b2
    return jnp.sqrt(jnp.square(z) + 1e-10)


if __name__ == "__main__":
    key = jax.random.PRNGKey(0)
    kx, kp = jax.random.split(key)

    N = 16  # small demo batch (wrapper pads to the lane-aligned tile internally)
    x = jax.random.normal(kx, (N, IN_DIM), dtype=jnp.float32)

    w1, b1, w2, b2 = init_params(kp)

    out = uq_net_std_forward(x, w1, b1, w2, b2)
    out = jax.block_until_ready(out)

    ref = reference_forward(x, w1, b1, w2, b2)
    assert out.shape == (N, OUT_DIM)
    assert jnp.allclose(out, ref, atol=1e-5, rtol=1e-5), "mismatch vs reference"

    print("KERNEL_OK")
</pallas_src>

<mosaic_0001>
module attributes {stable_mosaic.version = 11 : i64} {
  func.func @uq_std_kernel(%arg0: i32, %arg1: memref<1x256xf32, #tpu.memory_space<vmem>>, %arg2: memref<256x1xf32, #tpu.memory_space<vmem>>, %arg3: memref<256x1xf32, #tpu.memory_space<vmem>>, %arg4: memref<256x1xf32, #tpu.memory_space<vmem>>, %arg5: memref<1x1xf32, #tpu.memory_space<smem>>, %arg6: memref<1x256xf32, #tpu.memory_space<vmem>>) attributes {dimension_semantics = [#tpu.dimension_semantics<parallel>], iteration_bounds = array<i64: 1>, scalar_prefetch = 0 : i64, scratch_operands = 0 : i64, tpu.core_type = #tpu.core_type<tc>, window_params = [{transform_indices = @transform_0, window_bounds = array<i64: 1, 256>}, {pipeline_mode = #tpu.pipeline_mode<synchronous>, transform_indices = @transform_1, window_bounds = array<i64: 256, 1>}, {pipeline_mode = #tpu.pipeline_mode<synchronous>, transform_indices = @transform_2, window_bounds = array<i64: 256, 1>}, {pipeline_mode = #tpu.pipeline_mode<synchronous>, transform_indices = @transform_3, window_bounds = array<i64: 256, 1>}, {transform_indices = @transform_4, window_bounds = array<i64: 1, 1>}, {transform_indices = @transform_5, window_bounds = array<i64: 1, 256>}]} {
    %c0 = arith.constant 0 : index
    %c0_0 = arith.constant 0 : index
    %0 = vector.load %arg1[%c0, %c0_0] : memref<1x256xf32, #tpu.memory_space<vmem>>, vector<1x256xf32>
    %c0_1 = arith.constant 0 : index
    %c0_2 = arith.constant 0 : index
    %1 = vector.load %arg2[%c0_1, %c0_2] : memref<256x1xf32, #tpu.memory_space<vmem>>, vector<256x1xf32>
    %2 = vector.broadcast %1 : vector<256x1xf32> to vector<256x256xf32>
    %3 = vector.broadcast %0 : vector<1x256xf32> to vector<256x256xf32>
    %4 = arith.mulf %2, %3 : vector<256x256xf32>
    %c0_3 = arith.constant 0 : index
    %c0_4 = arith.constant 0 : index
    %5 = vector.load %arg3[%c0_3, %c0_4] : memref<256x1xf32, #tpu.memory_space<vmem>>, vector<256x1xf32>
    %6 = vector.broadcast %5 : vector<256x1xf32> to vector<256x256xf32>
    %7 = arith.addf %4, %6 : vector<256x256xf32>
    %cst = arith.constant 0.000000e+00 : f32
    %8 = vector.broadcast %cst : f32 to vector<256x256xf32>
    %9 = arith.maximumf %7, %8 : vector<256x256xf32>
    %c0_5 = arith.constant 0 : index
    %c0_6 = arith.constant 0 : index
    %10 = vector.load %arg4[%c0_5, %c0_6] : memref<256x1xf32, #tpu.memory_space<vmem>>, vector<256x1xf32>
    %11 = vector.broadcast %10 : vector<256x1xf32> to vector<256x256xf32>
    %12 = arith.mulf %9, %11 : vector<256x256xf32>
    %cst_7 = arith.constant dense<0.000000e+00> : vector<256xf32>
    %13 = vector.multi_reduction <add>, %12, %cst_7 [0] : vector<256x256xf32> to vector<256xf32>
    %14 = vector.shape_cast %13 : vector<256xf32> to vector<1x256xf32>
    %c0_8 = arith.constant 0 : index
    %c0_9 = arith.constant 0 : index
    %15 = memref.load %arg5[%c0_8, %c0_9] : memref<1x1xf32, #tpu.memory_space<smem>>
    %16 = vector.broadcast %15 : f32 to vector<1x256xf32>
    %17 = arith.addf %14, %16 : vector<1x256xf32>
    %18 = arith.mulf %17, %17 : vector<1x256xf32>
    %cst_10 = arith.constant 1.000000e-10 : f32
    %19 = vector.broadcast %cst_10 : f32 to vector<1x256xf32>
    %20 = arith.addf %18, %19 : vector<1x256xf32>
    %21 = math.sqrt %20 : vector<1x256xf32>
    %c0_11 = arith.constant 0 : index
    %c0_12 = arith.constant 0 : index
    %22 = vector.load %arg6[%c0_11, %c0_12] : memref<1x256xf32, #tpu.memory_space<vmem>>, vector<1x256xf32>
    tpu.vector_store %arg6[%c0_11, %c0_12], %21 {strides = array<i32>} : memref<1x256xf32, #tpu.memory_space<vmem>>, vector<1x256xf32>,
    return
  }
  func.func @transform_0(%arg0: i32) -> (i32, i32) {
    %c0_i32 = arith.constant 0 : i32
    %c0_i32_0 = arith.constant 0 : i32
    return %c0_i32, %arg0 : i32, i32
  }
  func.func @transform_1(%arg0: i32) -> (i32, i32) {
    %c0_i32 = arith.constant 0 : i32
    %c0_i32_0 = arith.constant 0 : i32
    %c0_i32_1 = arith.constant 0 : i32
    return %c0_i32, %c0_i32_0 : i32, i32
  }
  func.func @transform_2(%arg0: i32) -> (i32, i32) {
    %c0_i32 = arith.constant 0 : i32
    %c0_i32_0 = arith.constant 0 : i32
    %c0_i32_1 = arith.constant 0 : i32
    return %c0_i32, %c0_i32_0 : i32, i32
  }
  func.func @transform_3(%arg0: i32) -> (i32, i32) {
    %c0_i32 = arith.constant 0 : i32
    %c0_i32_0 = arith.constant 0 : i32
    %c0_i32_1 = arith.constant 0 : i32
    return %c0_i32, %c0_i32_0 : i32, i32
  }
  func.func @transform_4(%arg0: i32) -> (i32, i32) {
    %c0_i32 = arith.constant 0 : i32
    %c0_i32_0 = arith.constant 0 : i32
    %c0_i32_1 = arith.constant 0 : i32
    return %c0_i32, %c0_i32_0 : i32, i32
  }
  func.func @transform_5(%arg0: i32) -> (i32, i32) {
    %c0_i32 = arith.constant 0 : i32
    %c0_i32_0 = arith.constant 0 : i32
    return %c0_i32, %arg0 : i32, i32
  }
}

</mosaic_0001>

<bundles_post_ra>
// kernel: tpu_custom_call.1
= control target key start
LH: loop header
LB: loop body
LE: loop exit
PB: predicated region body
PF: predicated region fallthrough
CT: control target
= control target key end

     0   :  { %v1030_v2 = vmov 0   ;;  %s1745_s0 = inlined_call_operand.vmem [shape: f32[1,256], index: 0, kind: input, shape index: {}]   ;;  %s1746_s1 = inlined_call_operand.vmem [shape: f32[256,1], index: 1, kind: input, shape index: {}]   ;;  %s1747_s2 = inlined_call_operand.vmem [shape: f32[256,1], index: 2, kind: input, shape index: {}]   ;;  %s1748_s3 = inlined_call_operand.vmem [shape: f32[256,1], index: 3, kind: input, shape index: {}]   ;;  %s1749_s4 = inlined_call_operand.<no memory space> [shape: f32[1,1], index: 4, kind: input, shape index: {}]   ;;  %s1750_s5 = inlined_call_operand.hbm [shape: f32[1,256], index: 5, kind: output, shape index: {}]  }
   0x1   :  { %v25_v0 = vld [vmem:[%s1746_s1 + $0x10] sm:$0xff]  ;;  %v23_v1 = vld [vmem:[%s1746_s1] sm:$0xff]  ;;  %1003 = vset.pattern.permute.xlu1 %v1030_v2  ;;  %1002 = vset.pattern.permute.xlu0 %v1030_v2  ;;  %v26_v3 = vld [vmem:[%s1746_s1 + $0x18] sm:$0xff] }
   0x2   :  { %67 = vperm.xlu1 %1003, %v25_v0   ;;  %57 = vperm.xlu0 %1002, %v23_v1   ;;  %v24_v4 = vld [vmem:[%s1746_s1 + $0x8] sm:$0xff]  ;;  %v27_v6 = vld [vmem:[%s1746_s1 + $0x20] sm:$0xff]  ;;  %v30_v7 = vld [vmem:[%s1746_s1 + $0x38] sm:$0xff] }
   0x3   :  { %v28_v5 = vld [vmem:[%s1746_s1 + $0x28] sm:$0xff]  ;;  %v29_v8 = vld [vmem:[%s1746_s1 + $0x30] sm:$0xff]  ;;  %v31_v10 = vld [vmem:[%s1746_s1 + $0x40] sm:$0xff] }
   0x4   :  { %v32_v9 = vld [vmem:[%s1746_s1 + $0x48] sm:$0xff]  ;;  %v34_v11 = vld [vmem:[%s1746_s1 + $0x58] sm:$0xff]  ;;  %v33_v12 = vld [vmem:[%s1746_s1 + $0x50] sm:$0xff] }
   0x5   :  { %v36_v13 = vld [vmem:[%s1746_s1 + $0x68] sm:$0xff]  ;;  %v35_v14 = vld [vmem:[%s1746_s1 + $0x60] sm:$0xff] }
   0x6   :  { %72 = vperm.xlu1 %1003, %v26_v3   ;;  %62 = vperm.xlu0 %1002, %v24_v4  }
   0xa   :  { %82 = vperm.xlu1 %1003, %v28_v5   ;;  %77 = vperm.xlu0 %1002, %v27_v6  }
   0xe   :  { %92 = vperm.xlu1 %1003, %v30_v7   ;;  %87 = vperm.xlu0 %1002, %v29_v8  }
  0x12   :  { %102 = vperm.xlu1 %1003, %v32_v9   ;;  %97 = vperm.xlu0 %1002, %v31_v10  }
  0x16   :  { %112 = vperm.xlu1 %1003, %v34_v11   ;;  %107 = vperm.xlu0 %1002, %v33_v12  }
  0x17   :  { %11 = vsyncpa [#allocation4], 0  ;;  %v38_v15 = vld [vmem:[%s1746_s1 + $0x78] sm:$0xff]  ;;  %v37_v16 = vld [vmem:[%s1746_s1 + $0x70] sm:$0xff] }
  0x18   :  { %v40_v17 = vld [vmem:[%s1746_s1 + $0x88] sm:$0xff]  ;;  %v39_v18 = vld [vmem:[%s1746_s1 + $0x80] sm:$0xff]  ;;  %v42_v19 = vld [vmem:[%s1746_s1 + $0x98] sm:$0xff] }
  0x19   :  { %v41_v20 = vld [vmem:[%s1746_s1 + $0x90] sm:$0xff]  ;;  %v44_v21 = vld [vmem:[%s1746_s1 + $0xa8] sm:$0xff]  ;;  %v43_v22 = vld [vmem:[%s1746_s1 + $0xa0] sm:$0xff] }
  0x1a   :  { %122 = vperm.xlu1 %1003, %v36_v13   ;;  %117 = vperm.xlu0 %1002, %v35_v14   ;;  %v46_v23 = vld [vmem:[%s1746_s1 + $0xb8] sm:$0xff]  ;;  %v45_v24 = vld [vmem:[%s1746_s1 + $0xb0] sm:$0xff]  ;;  %v48_v25 = vld [vmem:[%s1746_s1 + $0xc8] sm:$0xff] }
  0x1b   :  { %v47_v26 = vld [vmem:[%s1746_s1 + $0xc0] sm:$0xff]  ;;  %v50_v27 = vld [vmem:[%s1746_s1 + $0xd8] sm:$0xff]  ;;  %v49_v28 = vld [vmem:[%s1746_s1 + $0xd0] sm:$0xff] }
  0x1c   :  { %v52_v29 = vld [vmem:[%s1746_s1 + $0xe8] sm:$0xff]  ;;  %v51_v30 = vld [vmem:[%s1746_s1 + $0xe0] sm:$0xff]  ;;  %v54_v31 = vld [vmem:[%s1746_s1 + $0xf8] sm:$0xff] }
  0x1d   :  { %v53_v32 = vld [vmem:[%s1746_s1 + $0xf0] sm:$0xff]  ;;  %v291_v33 = vld [vmem:[%s1747_s2 + $0x8] sm:$0xff]  ;;  %v290_v34 = vld [vmem:[%s1747_s2] sm:$0xff] }
  0x1e   :  { %132 = vperm.xlu1 %1003, %v38_v15   ;;  %127 = vperm.xlu0 %1002, %v37_v16   ;;  %v293_v35 = vld [vmem:[%s1747_s2 + $0x18] sm:$0xff]  ;;  %v292_v36 = vld [vmem:[%s1747_s2 + $0x10] sm:$0xff]  ;;  %v295_v37 = vld [vmem:[%s1747_s2 + $0x28] sm:$0xff] }
  0x1f   :  { %v294_v38 = vld [vmem:[%s1747_s2 + $0x20] sm:$0xff]  ;;  %v297_v39 = vld [vmem:[%s1747_s2 + $0x38] sm:$0xff]  ;;  %v296_v40 = vld [vmem:[%s1747_s2 + $0x30] sm:$0xff] }
  0x20   :  { %v299_v41 = vld [vmem:[%s1747_s2 + $0x48] sm:$0xff]  ;;  %v298_v42 = vld [vmem:[%s1747_s2 + $0x40] sm:$0xff]  ;;  %v301_v43 = vld [vmem:[%s1747_s2 + $0x58] sm:$0xff] }
  0x21   :  { %v300_v44 = vld [vmem:[%s1747_s2 + $0x50] sm:$0xff]  ;;  %v303_v45 = vld [vmem:[%s1747_s2 + $0x68] sm:$0xff]  ;;  %v302_v46 = vld [vmem:[%s1747_s2 + $0x60] sm:$0xff] }
  0x22   :  { %142 = vperm.xlu1 %1003, %v40_v17   ;;  %137 = vperm.xlu0 %1002, %v39_v18   ;;  %v305_v47 = vld [vmem:[%s1747_s2 + $0x78] sm:$0xff]  ;;  %v304_v48 = vld [vmem:[%s1747_s2 + $0x70] sm:$0xff]  ;;  %v307_v49 = vld [vmem:[%s1747_s2 + $0x88] sm:$0xff] }
  0x23   :  { %v306_v50 = vld [vmem:[%s1747_s2 + $0x80] sm:$0xff]  ;;  %v309_v51 = vld [vmem:[%s1747_s2 + $0x98] sm:$0xff]  ;;  %v308_v52 = vld [vmem:[%s1747_s2 + $0x90] sm:$0xff] }
  0x24   :  { %v311_v53 = vld [vmem:[%s1747_s2 + $0xa8] sm:$0xff]  ;;  %v310_v54 = vld [vmem:[%s1747_s2 + $0xa0] sm:$0xff]  ;;  %v613_v57 = vld [vmem:[%s1748_s3 + $0x18] sm:$0xff] }
  0x25   :  { %v611_v55 = vld [vmem:[%s1748_s3 + $0x8] sm:$0xff]  ;;  %v610_v56 = vld [vmem:[%s1748_s3] sm:$0xff]  ;;  %v612_v58 = vld [vmem:[%s1748_s3 + $0x10] sm:$0xff] }
  0x26   :  { %152 = vperm.xlu1 %1003, %v42_v19   ;;  %147 = vperm.xlu0 %1002, %v41_v20   ;;  %v615_v59 = vld [vmem:[%s1748_s3 + $0x28] sm:$0xff]  ;;  %v614_v60 = vld [vmem:[%s1748_s3 + $0x20] sm:$0xff]  ;;  %v617_v61 = vld [vmem:[%s1748_s3 + $0x38] sm:$0xff] }
  0x27   :  { %v616_v62 = vld [vmem:[%s1748_s3 + $0x30] sm:$0xff]  ;;  %v619_v63 = vld [vmem:[%s1748_s3 + $0x48] sm:$0xff]  ;;  %v618_v0 = vld [vmem:[%s1748_s3 + $0x40] sm:$0xff] }
  0x28   :  { %v621_v3 = vld [vmem:[%s1748_s3 + $0x58] sm:$0xff]  ;;  %v620_v4 = vld [vmem:[%s1748_s3 + $0x50] sm:$0xff]  ;;  %v623_v7 = vld [vmem:[%s1748_s3 + $0x68] sm:$0xff] }
  0x29   :  { %v622_v8 = vld [vmem:[%s1748_s3 + $0x60] sm:$0xff]  ;;  %v625_v11 = vld [vmem:[%s1748_s3 + $0x78] sm:$0xff]  ;;  %v624_v12 = vld [vmem:[%s1748_s3 + $0x70] sm:$0xff] }
  0x2a   :  { %162 = vperm.xlu1 %1003, %v44_v21   ;;  %157 = vperm.xlu0 %1002, %v43_v22   ;;  %v627_v15 = vld [vmem:[%s1748_s3 + $0x88] sm:$0xff]  ;;  %v626_v16 = vld [vmem:[%s1748_s3 + $0x80] sm:$0xff]  ;;  %v629_v19 = vld [vmem:[%s1748_s3 + $0x98] sm:$0xff] }
  0x2b   :  { %v628_v20 = vld [vmem:[%s1748_s3 + $0x90] sm:$0xff] }
  0x2e   :  { %172 = vperm.xlu1 %1003, %v46_v23   ;;  %167 = vperm.xlu0 %1002, %v45_v24   ;;  %v630_v23 = vld [vmem:[%s1748_s3 + $0xa0] sm:$0xff]  ;;  %v312_v24 = vld [vmem:[%s1747_s2 + $0xb0] sm:$0xff] }
  0x32   :  { %182 = vperm.xlu1 %1003, %v48_v25   ;;  %177 = vperm.xlu0 %1002, %v47_v26  }
  0x36   :  { %192 = vperm.xlu1 %1003, %v50_v27   ;;  %187 = vperm.xlu0 %1002, %v49_v28   ;;  %v631_v27 = vld [vmem:[%s1748_s3 + $0xa8] sm:$0xff]  ;;  %v313_v28 = vld [vmem:[%s1747_s2 + $0xb8] sm:$0xff] }
  0x3a   :  { %202 = vperm.xlu1 %1003, %v52_v29   ;;  %197 = vperm.xlu0 %1002, %v51_v30  }
  0x3e   :  { %212 = vperm.xlu1 %1003, %v54_v31   ;;  %207 = vperm.xlu0 %1002, %v53_v32   ;;  %v632_v31 = vld [vmem:[%s1748_s3 + $0xb0] sm:$0xff]  ;;  %v314_v32 = vld [vmem:[%s1747_s2 + $0xc0] sm:$0xff] }
  0x42   :  { %329 = vperm.xlu1 %1003, %v291_v33   ;;  %324 = vperm.xlu0 %1002, %v290_v34  }
  0x46   :  { %339 = vperm.xlu1 %1003, %v293_v35   ;;  %334 = vperm.xlu0 %1002, %v292_v36   ;;  %v633_v35 = vld [vmem:[%s1748_s3 + $0xb8] sm:$0xff]  ;;  %v315_v36 = vld [vmem:[%s1747_s2 + $0xc8] sm:$0xff] }
  0x4a   :  { %349 = vperm.xlu1 %1003, %v295_v37   ;;  %344 = vperm.xlu0 %1002, %v294_v38  }
  0x4e   :  { %359 = vperm.xlu1 %1003, %v297_v39   ;;  %354 = vperm.xlu0 %1002, %v296_v40   ;;  %v634_v39 = vld [vmem:[%s1748_s3 + $0xc0] sm:$0xff]  ;;  %v316_v40 = vld [vmem:[%s1747_s2 + $0xd0] sm:$0xff] }
  0x52   :  { %369 = vperm.xlu1 %1003, %v299_v41   ;;  %364 = vperm.xlu0 %1002, %v298_v42  }
  0x56   :  { %379 = vperm.xlu1 %1003, %v301_v43   ;;  %374 = vperm.xlu0 %1002, %v300_v44   ;;  %v635_v43 = vld [vmem:[%s1748_s3 + $0xc8] sm:$0xff]  ;;  %v317_v44 = vld [vmem:[%s1747_s2 + $0xd8] sm:$0xff] }
  0x5a   :  { %389 = vperm.xlu1 %1003, %v303_v45   ;;  %384 = vperm.xlu0 %1002, %v302_v46  }
  0x5e   :  { %399 = vperm.xlu1 %1003, %v305_v47   ;;  %394 = vperm.xlu0 %1002, %v304_v48   ;;  %v636_v47 = vld [vmem:[%s1748_s3 + $0xd0] sm:$0xff]  ;;  %v318_v48 = vld [vmem:[%s1747_s2 + $0xe0] sm:$0xff] }
  0x62   :  { %409 = vperm.xlu1 %1003, %v307_v49   ;;  %404 = vperm.xlu0 %1002, %v306_v50  }
  0x66   :  { %419 = vperm.xlu1 %1003, %v309_v51   ;;  %414 = vperm.xlu0 %1002, %v308_v52   ;;  %v637_v51 = vld [vmem:[%s1748_s3 + $0xd8] sm:$0xff]  ;;  %v319_v52 = vld [vmem:[%s1747_s2 + $0xe8] sm:$0xff] }
  0x6a   :  { %429 = vperm.xlu1 %1003, %v311_v53   ;;  %424 = vperm.xlu0 %1002, %v310_v54  }
  0x6e   :  { %649 = vperm.xlu1 %1003, %v611_v55   ;;  %644 = vperm.xlu0 %1002, %v610_v56   ;;  %v638_v55 = vld [vmem:[%s1748_s3 + $0xe0] sm:$0xff]  ;;  %v320_v56 = vld [vmem:[%s1747_s2 + $0xf0] sm:$0xff] }
  0x72   :  { %659 = vperm.xlu1 %1003, %v613_v57   ;;  %654 = vperm.xlu0 %1002, %v612_v58  }
  0x76   :  { %669 = vperm.xlu1 %1003, %v615_v59   ;;  %664 = vperm.xlu0 %1002, %v614_v60   ;;  %v639_v59 = vld [vmem:[%s1748_s3 + $0xe8] sm:$0xff]  ;;  %v321_v60 = vld [vmem:[%s1747_s2 + $0xf8] sm:$0xff] }
  0x7a   :  { %679 = vperm.xlu1 %1003, %v617_v61   ;;  %674 = vperm.xlu0 %1002, %v616_v62  }
  0x7d   :  { %v1255_v1 = vpop.permute.xlu1 %67  ;;  %v1257_v2 = vpop.permute.xlu0 %57 }
  0x7e   :  { %689 = vperm.xlu1 %1003, %v619_v63   ;;  %684 = vperm.xlu0 %1002, %v618_v0   ;;  %v641_v63 = vld [vmem:[%s1748_s3 + $0xf8] sm:$0xff]  ;;  %v640_v0 = vld [vmem:[%s1748_s3 + $0xf0] sm:$0xff] }
  0x81   :  { %v1265_v5 = vpop.permute.xlu1 %72  ;;  %v1267_v6 = vpop.permute.xlu0 %62 }
  0x82   :  { %699 = vperm.xlu1 %1003, %v621_v3   ;;  %694 = vperm.xlu0 %1002, %v620_v4  }
  0x85   :  { %v1275_v9 = vpop.permute.xlu1 %82  ;;  %v1277_v10 = vpop.permute.xlu0 %77 }
  0x86   :  { %709 = vperm.xlu1 %1003, %v623_v7   ;;  %704 = vperm.xlu0 %1002, %v622_v8  }
  0x89   :  { %v1285_v13 = vpop.permute.xlu1 %92  ;;  %v1287_v14 = vpop.permute.xlu0 %87 }
  0x8a   :  { %719 = vperm.xlu1 %1003, %v625_v11   ;;  %714 = vperm.xlu0 %1002, %v624_v12  }
  0x8d   :  { %v1295_v17 = vpop.permute.xlu1 %102  ;;  %v1297_v18 = vpop.permute.xlu0 %97 }
  0x8e   :  { %729 = vperm.xlu1 %1003, %v627_v15   ;;  %724 = vperm.xlu0 %1002, %v626_v16  }
  0x91   :  { %v1305_v21 = vpop.permute.xlu1 %112  ;;  %v1307_v22 = vpop.permute.xlu0 %107 }
  0x92   :  { %739 = vperm.xlu1 %1003, %v629_v19   ;;  %734 = vperm.xlu0 %1002, %v628_v20  }
  0x95   :  { %v1315_v25 = vpop.permute.xlu1 %122  ;;  %v1317_v26 = vpop.permute.xlu0 %117 }
  0x96   :  { %744 = vperm.xlu1 %1003, %v630_v23   ;;  %434 = vperm.xlu0 %1002, %v312_v24   ;;  %v1751_v23 = vlaneseq }
  0x99   :  { %v1325_v29 = vpop.permute.xlu1 %132  ;;  %v1327_v30 = vpop.permute.xlu0 %127 }
  0x9a   :  { %749 = vperm.xlu1 %1003, %v631_v27   ;;  %439 = vperm.xlu0 %1002, %v313_v28   ;;  %v1436_v28 = vshrl.u32 %v1751_v23, 7 }
  0x9c   :  { %1780 = vst [vmem:[#allocation16_spill] sm:$0xff] %v1436_v28 }
  0x9d   :  { %v1335_v33 = vpop.permute.xlu1 %142  ;;  %v1337_v34 = vpop.permute.xlu0 %137 }
  0x9e   :  { %754 = vperm.xlu1 %1003, %v632_v31   ;;  %444 = vperm.xlu0 %1002, %v314_v32  }
  0xa1   :  { %v1345_v37 = vpop.permute.xlu1 %152  ;;  %v1347_v38 = vpop.permute.xlu0 %147 }
  0xa2   :  { %759 = vperm.xlu1 %1003, %v633_v35   ;;  %449 = vperm.xlu0 %1002, %v315_v36   ;;  %v218_v35 = vsub.s32 0, %v1436_v28  ;;  %v222_v36 = vsub.s32 1, %v1436_v28 }
  0xa5   :  { %v1355_v41 = vpop.permute.xlu1 %162  ;;  %v1357_v42 = vpop.permute.xlu0 %157 }
  0xa6   :  { %764 = vperm.xlu1 %1003, %v634_v39   ;;  %454 = vperm.xlu0 %1002, %v316_v40   ;;  %v22_v39 = vld [vmem:[%s1745_s0] sm:$0x3] }
  0xa9   :  { %v1365_v45 = vpop.permute.xlu1 %172  ;;  %v1367_v46 = vpop.permute.xlu0 %167 }
  0xaa   :  { %1770 = vst [vmem:[#allocation6_spill] sm:$0xff] %v1365_v45  ;;  %1771 = vst [vmem:[#allocation7_spill] sm:$0xff] %v1367_v46  ;;  %769 = vperm.xlu1 %1003, %v635_v43   ;;  %459 = vperm.xlu0 %1002, %v317_v44   ;;  %v1451_v44 = vrot.slane %v22_v39, %v218_v35 }
  0xac   :  { %v1497_v23 = vmul.f32 %v1451_v44, %v1287_v14  ;;  %v1541_v45 = vmul.f32 %v1451_v44, %v1315_v25 }
  0xad   :  { %v1375_v49 = vpop.permute.xlu1 %182  ;;  %v1377_v50 = vpop.permute.xlu0 %177 }
  0xae   :  { %1772 = vst [vmem:[#allocation8_spill] sm:$0xff] %v1375_v49  ;;  %1773 = vst [vmem:[#allocation9_spill] sm:$0xff] %v1377_v50  ;;  %774 = vperm.xlu1 %1003, %v636_v47   ;;  %464 = vperm.xlu0 %1002, %v318_v48   ;;  %v1453_v47 = vrot.slane %v22_v39, %v222_v36  ;;  %v1489_v39 = vmul.f32 %v1451_v44, %v1285_v13 }
  0xb0   :  { %v229_v35 = vmul.f32 %v1453_v47, %v1267_v6  ;;  %v1481_v36 = vmul.f32 %v1453_v47, %v1275_v9  ;;  %v1537_v49 = vmul.f32 %v1453_v47, %v1307_v22 }
  0xb1   :  { %v1385_v53 = vpop.permute.xlu1 %192  ;;  %v1387_v54 = vpop.permute.xlu0 %187 }
  0xb2   :  { %1774 = vst [vmem:[#allocation10_spill] sm:$0xff] %v1385_v53  ;;  %1775 = vst [vmem:[#allocation11_spill] sm:$0xff] %v1387_v54  ;;  %779 = vperm.xlu1 %1003, %v637_v51   ;;  %469 = vperm.xlu0 %1002, %v319_v52   ;;  %v230_v52 = vmul.f32 %v1451_v44, %v1255_v1 }
  0xb5   :  { %v1395_v57 = vpop.permute.xlu1 %202  ;;  %v1397_v58 = vpop.permute.xlu0 %197 }
  0xb6   :  { %1776 = vst [vmem:[#allocation12_spill] sm:$0xff] %v1395_v57  ;;  %1777 = vst [vmem:[#allocation13_spill] sm:$0xff] %v1397_v58  ;;  %784 = vperm.xlu1 %1003, %v638_v55   ;;  %474 = vperm.xlu0 %1002, %v320_v56   ;;  %v231_v55 = vmul.f32 %v1453_v47, %v1255_v1  ;;  %v226_v56 = vmul.f32 %v1451_v44, %v1257_v2 }
  0xb7   :  { %v1477_v1 = vmul.f32 %v1451_v44, %v1275_v9  ;;  %v1501_v9 = vmul.f32 %v1453_v47, %v1287_v14  ;;  %v1521_v14 = vmul.f32 %v1453_v47, %v1297_v18  ;;  %v1525_v57 = vmul.f32 %v1451_v44, %v1305_v21 }
  0xb8   :  { %v1529_v58 = vmul.f32 %v1453_v47, %v1305_v21  ;;  %v1545_v21 = vmul.f32 %v1453_v47, %v1315_v25  ;;  %v1565_v25 = vmul.f32 %v1453_v47, %v1325_v29 }
  0xb9   :  { %v1405_v61 = vpop.permute.xlu1 %212  ;;  %v1407_v62 = vpop.permute.xlu0 %207 }
  0xba   :  { %1778 = vst [vmem:[#allocation14_spill] sm:$0xff] %v1405_v61  ;;  %1779 = vst [vmem:[#allocation15_spill] sm:$0xff] %v1407_v62  ;;  %789 = vperm.xlu1 %1003, %v639_v59   ;;  %479 = vperm.xlu0 %1002, %v321_v60   ;;  %v227_v59 = vmul.f32 %v1453_v47, %v1257_v2  ;;  %v232_v60 = vmul.f32 %v1451_v44, %v1265_v5 }
  0xbb   :  { %v234_v2 = vmul.f32 %v1451_v44, %v1277_v10  ;;  %v1517_v62 = vmul.f32 %v1451_v44, %v1297_v18  ;;  %1788 = vst [vmem:[#allocation24_spill] sm:$0xff] %v1565_v25 }
  0xbd   :  { %v330_v3 = vpop.permute.xlu1 %329  ;;  %v325_v4 = vpop.permute.xlu0 %324 }
  0xbe   :  { %799 = vperm.xlu1 %1003, %v641_v63   ;;  %794 = vperm.xlu0 %1002, %v640_v0   ;;  %v233_v63 = vmul.f32 %v1453_v47, %v1265_v5  ;;  %v228_v0 = vmul.f32 %v1451_v44, %v1267_v6  ;;  %v235_v5 = vmul.f32 %v1453_v47, %v1277_v10 }
  0xbf   :  { %v1493_v6 = vmul.f32 %v1453_v47, %v1285_v13  ;;  %v1509_v10 = vmul.f32 %v1451_v44, %v1295_v17  ;;  %v1513_v13 = vmul.f32 %v1453_v47, %v1295_v17  ;;  %v485_v54 = vadd.f32 %v330_v3, %v229_v35 }
  0xc0   :  { %v484_v53 = vadd.f32 %v330_v3, %v228_v0  ;;  %v1533_v17 = vmul.f32 %v1451_v44, %v1307_v22  ;;  %v482_v18 = vadd.f32 %v325_v4, %v226_v56  ;;  %v483_v50 = vadd.f32 %v325_v4, %v227_v59 }
  0xc1   :  { %v1415_v7 = vpop.permute.xlu1 %339  ;;  %v1417_v8 = vpop.permute.xlu0 %334  ;;  %v1549_v3 = vmul.f32 %v1451_v44, %v1317_v26  ;;  %v1553_v0 = vmul.f32 %v1453_v47, %v1317_v26  ;;  %v1561_v4 = vmul.f32 %v1451_v44, %v1325_v29  ;;  %v1569_v59 = vmul.f32 %v1451_v44, %v1327_v30 }
  0xc2   :  { %v1573_v26 = vmul.f32 %v1453_v47, %v1327_v30  ;;  %v1577_v35 = vmul.f32 %v1451_v44, %v1335_v33  ;;  %v548_v46 = vmax.f32 %v484_v53, 0.0  ;;  %v546_v29 = vmax.f32 %v482_v18, 0.0 }
  0xc3   :  { %v1587_v30 = vmul.f32 %v1451_v44, %v1337_v34  ;;  %v1599_v53 = vmul.f32 %v1453_v47, %v1345_v37 }
  0xc4   :  { %1789 = vst [vmem:[#allocation25_spill] sm:$0xff] %v1577_v35  ;;  %v489_v35 = vadd.f32 %v1415_v7, %v233_v63 }
  0xc5   :  { %v1419_v11 = vpop.permute.xlu1 %349  ;;  %v1421_v12 = vpop.permute.xlu0 %344  ;;  %1791 = vst [vmem:[#allocation27_spill] sm:$0xff] %v1587_v30 }
  0xc9   :  { %v1423_v15 = vpop.permute.xlu1 %359  ;;  %v1425_v16 = vpop.permute.xlu0 %354 }
  0xcd   :  { %v1427_v19 = vpop.permute.xlu1 %369  ;;  %v1429_v20 = vpop.permute.xlu0 %364 }
  0xd1   :  { %v1431_v24 = vpop.permute.xlu1 %379  ;;  %v1433_v27 = vpop.permute.xlu0 %374 }
  0xd5   :  { %v1438_v31 = vpop.permute.xlu1 %389  ;;  %v1440_v32 = vpop.permute.xlu0 %384 }
  0xd9   :  { %v1447_v40 = vpop.permute.xlu1 %399  ;;  %v1449_v43 = vpop.permute.xlu0 %394 }
  0xda   :  { %1781 = vst [vmem:[#allocation17_spill] sm:$0xff] %v1447_v40 }
  0xdd   :  { %v1455_v48 = vpop.permute.xlu1 %409  ;;  %v1457_v51 = vpop.permute.xlu0 %404 }
  0xde   :  { %1782 = vst [vmem:[#allocation18_spill] sm:$0xff] %v1455_v48  ;;  %1783 = vst [vmem:[#allocation19_spill] sm:$0xff] %v1457_v51  ;;  %v487_v48 = vadd.f32 %v1417_v8, %v231_v55  ;;  %v1591_v51 = vmul.f32 %v1453_v47, %v1337_v34  ;;  %v490_v34 = vadd.f32 %v1421_v12, %v234_v2 }
  0xe0   :  { %1792 = vst [vmem:[#allocation28_spill] sm:$0xff] %v1591_v51  ;;  %v491_v51 = vadd.f32 %v1421_v12, %v235_v5  ;;  %v553_v5 = vmax.f32 %v489_v35, 0.0 }
  0xe1   :  { %v1503_v28 = vpop.permute.xlu1 %419  ;;  %v1505_v61 = vpop.permute.xlu0 %414 }
  0xe2   :  { %1784 = vst [vmem:[#allocation20_spill] sm:$0xff] %v1503_v28  ;;  %1785 = vst [vmem:[#allocation21_spill] sm:$0xff] %v1505_v61  ;;  %v547_v28 = vmax.f32 %v483_v50, 0.0  ;;  %v486_v61 = vadd.f32 %v1417_v8, %v230_v52 }
  0xe4   :  { %v550_v30 = vmax.f32 %v486_v61, 0.0 }
  0xe5   :  { %v1555_v22 = vpop.permute.xlu1 %429  ;;  %v1557_v56 = vpop.permute.xlu0 %424 }
  0xe6   :  { %1786 = vst [vmem:[#allocation22_spill] sm:$0xff] %v1555_v22  ;;  %1787 = vst [vmem:[#allocation23_spill] sm:$0xff] %v1557_v56  ;;  %v1581_v22 = vmul.f32 %v1453_v47, %v1335_v33  ;;  %v549_v56 = vmax.f32 %v485_v54, 0.0  ;;  %v1595_v33 = vmul.f32 %v1451_v44, %v1345_v37  ;;  %v1607_v37 = vmul.f32 %v1451_v44, %v1347_v38 }
  0xe8   :  { %1790 = vst [vmem:[#allocation26_spill] sm:$0xff] %v1581_v22  ;;  %1793 = vst [vmem:[#allocation29_spill] sm:$0xff] %v1595_v33  ;;  %v488_v22 = vadd.f32 %v1415_v7, %v232_v60  ;;  %v551_v33 = vmax.f32 %v487_v48, 0.0  ;;  %v1619_v7 = vmul.f32 %v1453_v47, %v1355_v41  ;;  %v492_v48 = vadd.f32 %v1419_v11, %v1477_v1 }
  0xe9   :  { %v650_v50 = vpop.permute.xlu1 %649  ;;  %v645_v54 = vpop.permute.xlu0 %644  ;;  %v493_v60 = vadd.f32 %v1419_v11, %v1481_v36  ;;  %v1631_v1 = vmul.f32 %v1451_v44, %v1357_v42  ;;  %v1635_v11 = vmul.f32 %v1453_v47, %v1357_v42  ;;  %v498_v42 = vadd.f32 %v1429_v20, %v1517_v62 }
  0xea   :  { %v804_v52 = vmul.f32 %v650_v50, %v548_v46  ;;  %v805_v8 = vmul.f32 %v650_v50, %v549_v56  ;;  %v802_v55 = vmul.f32 %v645_v54, %v546_v29  ;;  %v803_v18 = vmul.f32 %v645_v54, %v547_v28 }
  0xeb   :  { %v1611_v46 = vmul.f32 %v1453_v47, %v1347_v38  ;;  %v1615_v28 = vmul.f32 %v1451_v44, %v1355_v41  ;;  %v552_v38 = vmax.f32 %v488_v22, 0.0  ;;  %v554_v56 = vmax.f32 %v490_v34, 0.0 }
  0xec   :  { %v866_v25 = vadd.f32 %v804_v52, %v802_v55  ;;  %v903_v40 = vadd.f32 %v805_v8, %v803_v18  ;;  %v555_v29 = vmax.f32 %v491_v51, 0.0  ;;  %v494_v50 = vadd.f32 %v1425_v16, %v1497_v23 }
  0xed   :  { %v660_v61 = vpop.permute.xlu1 %659  ;;  %v655_v12 = vpop.permute.xlu0 %654  ;;  %v495_v41 = vadd.f32 %v1425_v16, %v1501_v9  ;;  %v496_v16 = vadd.f32 %v1423_v15, %v1489_v39  ;;  %v499_v34 = vadd.f32 %v1429_v20, %v1521_v14  ;;  %v500_v39 = vadd.f32 %v1427_v19, %v1509_v10 }
  0xee   :  { %v806_v63 = vmul.f32 %v655_v12, %v550_v30  ;;  %v807_v2 = vmul.f32 %v655_v12, %v551_v33  ;;  %v808_v36 = vmul.f32 %v660_v61, %v552_v38  ;;  %v809_v22 = vmul.f32 %v660_v61, %v553_v5 }
  0xef   :  { %v556_v30 = vmax.f32 %v492_v48, 0.0  ;;  %v557_v33 = vmax.f32 %v493_v60, 0.0  ;;  %v558_v55 = vmax.f32 %v494_v50, 0.0  ;;  %v559_v18 = vmax.f32 %v495_v41, 0.0 }
  0xf0   :  { %v867_v54 = vadd.f32 %v866_v25, %v806_v63  ;;  %v904_v52 = vadd.f32 %v903_v40, %v807_v2  ;;  %v497_v40 = vadd.f32 %v1423_v15, %v1493_v6  ;;  %v501_v15 = vadd.f32 %v1427_v19, %v1513_v13 }
  0xf1   :  { %v670_v35 = vpop.permute.xlu1 %669  ;;  %v665_v51 = vpop.permute.xlu0 %664  ;;  %v560_v5 = vmax.f32 %v496_v16, 0.0  ;;  %v562_v50 = vmax.f32 %v498_v42, 0.0  ;;  %v563_v20 = vmax.f32 %v499_v34, 0.0  ;;  %v502_v14 = vadd.f32 %v1433_v27, %v1533_v17 }
  0xf2   :  { %v810_v23 = vmul.f32 %v665_v51, %v554_v56  ;;  %v811_v8 = vmul.f32 %v665_v51, %v555_v29  ;;  %v868_v9 = vadd.f32 %v867_v54, %v808_v36  ;;  %v905_v25 = vadd.f32 %v904_v52, %v809_v22 }
  0xf3   :  { %v812_v61 = vmul.f32 %v670_v35, %v556_v30  ;;  %v813_v12 = vmul.f32 %v670_v35, %v557_v33  ;;  %v561_v56 = vmax.f32 %v497_v40, 0.0  ;;  %v503_v41 = vadd.f32 %v1433_v27, %v1537_v49 }
  0xf4   :  { %v869_v48 = vadd.f32 %v868_v9, %v810_v23  ;;  %v906_v60 = vadd.f32 %v905_v25, %v811_v8  ;;  %v564_v19 = vmax.f32 %v500_v39, 0.0  ;;  %v565_v13 = vmax.f32 %v501_v15, 0.0 }
  0xf5   :  { %v680_v63 = vpop.permute.xlu1 %679  ;;  %v675_v2 = vpop.permute.xlu0 %674  ;;  %v504_v35 = vadd.f32 %v1431_v24, %v1525_v57  ;;  %v505_v51 = vadd.f32 %v1431_v24, %v1529_v58  ;;  %v566_v16 = vmax.f32 %v502_v14, 0.0  ;;  %v567_v49 = vmax.f32 %v503_v41, 0.0 }
  0xf6   :  { %v814_v6 = vmul.f32 %v675_v2, %v558_v55  ;;  %v815_v38 = vmul.f32 %v675_v2, %v559_v18  ;;  %v870_v62 = vadd.f32 %v869_v48, %v812_v61  ;;  %v907_v29 = vadd.f32 %v906_v60, %v813_v12 }
  0xf7   :  { %v816_v54 = vmul.f32 %v680_v63, %v560_v5  ;;  %v817_v52 = vmul.f32 %v680_v63, %v561_v56  ;;  %v506_v27 = vadd.f32 %v1440_v32, %v1549_v3  ;;  %v507_v40 = vadd.f32 %v1440_v32, %v1553_v0 }
  0xf8   :  { %v871_v10 = vadd.f32 %v870_v62, %v814_v6  ;;  %v908_v36 = vadd.f32 %v907_v29, %v815_v38  ;;  %v568_v42 = vmax.f32 %v504_v35, 0.0  ;;  %v569_v58 = vmax.f32 %v505_v51, 0.0  ;;  %v1795_v62 = vld [vmem:[#allocation24_spill] sm:$0xff] }
  0xf9   :  { %v690_v22 = vpop.permute.xlu1 %689  ;;  %v685_v30 = vpop.permute.xlu0 %684  ;;  %v508_v24 = vadd.f32 %v1438_v31, %v1541_v45  ;;  %v509_v34 = vadd.f32 %v1438_v31, %v1545_v21  ;;  %v570_v63 = vmax.f32 %v506_v27, 0.0  ;;  %v571_v32 = vmax.f32 %v507_v40, 0.0  ;;  %v1794_v21 = vld [vmem:[#allocation17_spill] sm:$0xff] }
  0xfa   :  { %v818_v33 = vmul.f32 %v685_v30, %v562_v50  ;;  %v819_v23 = vmul.f32 %v685_v30, %v563_v20  ;;  %v872_v17 = vadd.f32 %v871_v10, %v816_v54  ;;  %v909_v8 = vadd.f32 %v908_v36, %v817_v52  ;;  %v1797_v52 = vld [vmem:[#allocation19_spill] sm:$0xff]  ;;  %v1798_v36 = vld [vmem:[#allocation28_spill] sm:$0xff] }
  0xfb   :  { %v820_v9 = vmul.f32 %v690_v22, %v564_v19  ;;  %v821_v25 = vmul.f32 %v690_v22, %v565_v13  ;;  %v510_v0 = vadd.f32 %v1449_v43, %v1569_v59  ;;  %v511_v2 = vadd.f32 %v1449_v43, %v1573_v26  ;;  %v1796_v26 = vld [vmem:[#allocation27_spill] sm:$0xff] }
  0xfc   :  { %v873_v55 = vadd.f32 %v872_v17, %v818_v33  ;;  %v910_v57 = vadd.f32 %v909_v8, %v819_v23  ;;  %v572_v5 = vmax.f32 %v508_v24, 0.0  ;;  %v573_v31 = vmax.f32 %v509_v34, 0.0  ;;  %v1799_v23 = vld [vmem:[#allocation25_spill] sm:$0xff]  ;;  %v1800_v17 = vld [vmem:[#allocation18_spill] sm:$0xff] }
  0xfd   :  { %v700_v18 = vpop.permute.xlu1 %699  ;;  %v695_v61 = vpop.permute.xlu0 %694  ;;  %v512_v56 = vadd.f32 %v1794_v21, %v1561_v4  ;;  %v513_v29 = vadd.f32 %v1794_v21, %v1795_v62  ;;  %v574_v54 = vmax.f32 %v510_v0, 0.0  ;;  %v575_v43 = vmax.f32 %v511_v2, 0.0  ;;  %v1804_v0 = vld [vmem:[#allocation20_spill] sm:$0xff] }
  0xfe   :  { %v822_v12 = vmul.f32 %v695_v61, %v566_v16  ;;  %v823_v48 = vmul.f32 %v695_v61, %v567_v49  ;;  %v874_v3 = vadd.f32 %v873_v55, %v820_v9  ;;  %v911_v60 = vadd.f32 %v910_v57, %v821_v25  ;;  %v1801_v16 = vld [vmem:[#allocation26_spill] sm:$0xff] }
  0xff   :  { %v824_v39 = vmul.f32 %v700_v18, %v568_v42  ;;  %v825_v15 = vmul.f32 %v700_v18, %v569_v58  ;;  %v514_v10 = vadd.f32 %v1797_v52, %v1796_v26  ;;  %v515_v22 = vadd.f32 %v1797_v52, %v1798_v36  ;;  %v1802_v42 = vld [vmem:[#allocation21_spill] sm:$0xff] }
 0x100   :  { %v875_v6 = vadd.f32 %v874_v3, %v822_v12  ;;  %v912_v45 = vadd.f32 %v911_v60, %v823_v48  ;;  %v576_v30 = vmax.f32 %v512_v56, 0.0  ;;  %v577_v33 = vmax.f32 %v513_v29, 0.0 }
 0x101   :  { %v710_v38 = vpop.permute.xlu1 %709  ;;  %v705_v50 = vpop.permute.xlu0 %704  ;;  %v516_v8 = vadd.f32 %v1800_v17, %v1799_v23  ;;  %v517_v49 = vadd.f32 %v1800_v17, %v1801_v16  ;;  %v578_v57 = vmax.f32 %v514_v10, 0.0  ;;  %v579_v18 = vmax.f32 %v515_v22, 0.0 }
 0x102   :  { %v826_v20 = vmul.f32 %v705_v50, %v570_v63  ;;  %v827_v14 = vmul.f32 %v705_v50, %v571_v32  ;;  %v876_v59 = vadd.f32 %v875_v6, %v824_v39  ;;  %v913_v41 = vadd.f32 %v912_v45, %v825_v15  ;;  %v1803_v32 = vld [vmem:[#allocation29_spill] sm:$0xff] }
 0x103   :  { %v828_v19 = vmul.f32 %v710_v38, %v572_v5  ;;  %v829_v13 = vmul.f32 %v710_v38, %v573_v31  ;;  %v518_v58 = vadd.f32 %v1802_v42, %v1607_v37  ;;  %v519_v24 = vadd.f32 %v1802_v42, %v1611_v46  ;;  %v1805_v31 = vld [vmem:[#allocation23_spill] sm:$0xff] }
 0x104   :  { %v877_v35 = vadd.f32 %v876_v59, %v826_v20  ;;  %v914_v4 = vadd.f32 %v913_v41, %v827_v14  ;;  %v580_v60 = vmax.f32 %v516_v8, 0.0  ;;  %v581_v63 = vmax.f32 %v517_v49, 0.0  ;;  %v1806_v59 = vld [vmem:[#allocation7_spill] sm:$0xff] }
 0x105   :  { %v720_v51 = vpop.permute.xlu1 %719  ;;  %v715_v27 = vpop.permute.xlu0 %714  ;;  %v520_v2 = vadd.f32 %v1804_v0, %v1803_v32  ;;  %v521_v39 = vadd.f32 %v1804_v0, %v1599_v53  ;;  %v582_v5 = vmax.f32 %v518_v58, 0.0  ;;  %v583_v46 = vmax.f32 %v519_v24, 0.0  ;;  %v1809_v0 = vld [vmem:[#allocation9_spill] sm:$0xff] }
 0x106   :  { %v830_v40 = vmul.f32 %v715_v27, %v574_v54  ;;  %v831_v9 = vmul.f32 %v715_v27, %v575_v43  ;;  %v878_v25 = vadd.f32 %v877_v35, %v828_v19  ;;  %v915_v55 = vadd.f32 %v914_v4, %v829_v13 }
 0x107   :  { %v832_v34 = vmul.f32 %v720_v51, %v576_v30  ;;  %v833_v61 = vmul.f32 %v720_v51, %v577_v33  ;;  %v522_v21 = vadd.f32 %v1805_v31, %v1631_v1  ;;  %v523_v56 = vadd.f32 %v1805_v31, %v1635_v11  ;;  %v1807_v11 = vld [vmem:[#allocation22_spill] sm:$0xff] }
 0x108   :  { %v879_v12 = vadd.f32 %v878_v25, %v830_v40  ;;  %v916_v48 = vadd.f32 %v915_v55, %v831_v9  ;;  %v270_v53 = vmul.f32 %v1451_v44, %v1806_v59  ;;  %v271_v41 = vmul.f32 %v1453_v47, %v1806_v59 }
 0x109   :  { %v730_v3 = vpop.permute.xlu1 %729  ;;  %v725_v15 = vpop.permute.xlu0 %724  ;;  %v584_v54 = vmax.f32 %v520_v2, 0.0  ;;  %v585_v43 = vmax.f32 %v521_v39, 0.0  ;;  %v524_v22 = vadd.f32 %v1807_v11, %v1615_v28  ;;  %v525_v19 = vadd.f32 %v1807_v11, %v1619_v7  ;;  %v1808_v7 = vld [vmem:[#allocation6_spill] sm:$0xff] }
 0x10a   :  { %v834_v6 = vmul.f32 %v725_v15, %v578_v57  ;;  %v835_v45 = vmul.f32 %v725_v15, %v579_v18  ;;  %v880_v37 = vadd.f32 %v879_v12, %v832_v34  ;;  %v917_v38 = vadd.f32 %v916_v48, %v833_v61 }
 0x10b   :  { %v836_v62 = vmul.f32 %v730_v3, %v580_v60  ;;  %v837_v29 = vmul.f32 %v730_v3, %v581_v63  ;;  %v586_v13 = vmax.f32 %v522_v21, 0.0  ;;  %v587_v35 = vmax.f32 %v523_v56, 0.0 }
 0x10c   :  { %v881_v50 = vadd.f32 %v880_v37, %v834_v6  ;;  %v918_v20 = vadd.f32 %v917_v38, %v835_v45  ;;  %v588_v25 = vmax.f32 %v524_v22, 0.0  ;;  %v589_v55 = vmax.f32 %v525_v19, 0.0 }
 0x10d   :  { %v740_v14 = vpop.permute.xlu1 %739  ;;  %v735_v26 = vpop.permute.xlu0 %734  ;;  %v272_v42 = vmul.f32 %v1451_v44, %v1808_v7  ;;  %v273_v58 = vmul.f32 %v1453_v47, %v1808_v7  ;;  %v274_v2 = vmul.f32 %v1451_v44, %v1809_v0  ;;  %v275_v39 = vmul.f32 %v1453_v47, %v1809_v0 }
 0x10e   :  { %v838_v52 = vmul.f32 %v735_v26, %v582_v5  ;;  %v839_v10 = vmul.f32 %v735_v26, %v583_v46  ;;  %v882_v1 = vadd.f32 %v881_v50, %v836_v62  ;;  %v919_v36 = vadd.f32 %v918_v20, %v837_v29  ;;  %v1810_v29 = vld [vmem:[#allocation8_spill] sm:$0xff] }
 0x10f   :  { %v840_v4 = vmul.f32 %v740_v14, %v584_v54  ;;  %v841_v51 = vmul.f32 %v740_v14, %v585_v43  ;;  %v276_v50 = vmul.f32 %v1451_v44, %v1810_v29  ;;  %v277_v20 = vmul.f32 %v1453_v47, %v1810_v29 }
 0x110   :  { %v883_v30 = vadd.f32 %v882_v1, %v838_v52  ;;  %v920_v33 = vadd.f32 %v919_v36, %v839_v10  ;;  %v1811_v1 = vld [vmem:[#allocation11_spill] sm:$0xff] }
 0x111   :  { %v745_v23 = vpop.permute.xlu1 %744  ;;  %v435_v16 = vpop.permute.xlu0 %434  ;;  %v278_v36 = vmul.f32 %v1451_v44, %v1811_v1  ;;  %v279_v11 = vmul.f32 %v1453_v47, %v1811_v1 }
 0x112   :  { %v842_v17 = vmul.f32 %v745_v23, %v586_v13  ;;  %v843_v8 = vmul.f32 %v745_v23, %v587_v35  ;;  %v884_v49 = vadd.f32 %v883_v30, %v840_v4  ;;  %v921_v27 = vadd.f32 %v920_v33, %v841_v51 }
 0x113   :  { %v526_v40 = vadd.f32 %v435_v16, %v270_v53  ;;  %v527_v9 = vadd.f32 %v435_v16, %v271_v41  ;;  %v1812_v16 = vld [vmem:[#allocation10_spill] sm:$0xff] }
 0x114   :  { %v885_v28 = vadd.f32 %v884_v49, %v842_v17  ;;  %v922_v57 = vadd.f32 %v921_v27, %v843_v8  ;;  %v280_v49 = vmul.f32 %v1451_v44, %v1812_v16  ;;  %v281_v27 = vmul.f32 %v1453_v47, %v1812_v16 }
 0x115   :  { %v750_v18 = vpop.permute.xlu1 %749  ;;  %v440_v61 = vpop.permute.xlu0 %439  ;;  %v590_v12 = vmax.f32 %v526_v40, 0.0  ;;  %v591_v48 = vmax.f32 %v527_v9, 0.0 }
 0x116   :  { %v844_v24 = vmul.f32 %v750_v18, %v588_v25  ;;  %v845_v34 = vmul.f32 %v750_v18, %v589_v55  ;;  %v528_v63 = vadd.f32 %v440_v61, %v272_v42  ;;  %v529_v32 = vadd.f32 %v440_v61, %v273_v58  ;;  %v1813_v58 = vld [vmem:[#allocation13_spill] sm:$0xff] }
 0x118   :  { %v886_v3 = vadd.f32 %v885_v28, %v844_v24  ;;  %v923_v60 = vadd.f32 %v922_v57, %v845_v34  ;;  %v592_v46 = vmax.f32 %v528_v63, 0.0  ;;  %v593_v31 = vmax.f32 %v529_v32, 0.0 }
 0x119   :  { %v755_v15 = vpop.permute.xlu1 %754  ;;  %v445_v37 = vpop.permute.xlu0 %444  ;;  %v282_v24 = vmul.f32 %v1451_v44, %v1813_v58  ;;  %v283_v34 = vmul.f32 %v1453_v47, %v1813_v58 }
 0x11a   :  { %v846_v6 = vmul.f32 %v755_v15, %v590_v12  ;;  %v847_v45 = vmul.f32 %v755_v15, %v591_v48  ;;  %v530_v38 = vadd.f32 %v445_v37, %v274_v2  ;;  %v531_v5 = vadd.f32 %v445_v37, %v275_v39 }
 0x11c   :  { %v887_v21 = vadd.f32 %v886_v3, %v846_v6  ;;  %v924_v56 = vadd.f32 %v923_v60, %v847_v45  ;;  %v594_v41 = vmax.f32 %v530_v38, 0.0  ;;  %v595_v54 = vmax.f32 %v531_v5, 0.0  ;;  %v1814_v6 = vld [vmem:[#allocation12_spill] sm:$0xff] }
 0x11d   :  { %v760_v62 = vpop.permute.xlu1 %759  ;;  %v450_v53 = vpop.permute.xlu0 %449  ;;  %v284_v45 = vmul.f32 %v1451_v44, %v1814_v6  ;;  %v285_v37 = vmul.f32 %v1453_v47, %v1814_v6 }
 0x11e   :  { %v848_v14 = vmul.f32 %v760_v62, %v592_v46  ;;  %v849_v59 = vmul.f32 %v760_v62, %v593_v31  ;;  %v532_v52 = vadd.f32 %v450_v53, %v276_v50  ;;  %v533_v10 = vadd.f32 %v450_v53, %v277_v20 }
 0x120   :  { %v888_v43 = vadd.f32 %v887_v21, %v848_v14  ;;  %v925_v26 = vadd.f32 %v924_v56, %v849_v59  ;;  %v596_v30 = vmax.f32 %v532_v52, 0.0  ;;  %v597_v33 = vmax.f32 %v533_v10, 0.0 }
 0x121   :  { %v765_v22 = vpop.permute.xlu1 %764  ;;  %v455_v35 = vpop.permute.xlu0 %454 }
 0x122   :  { %v850_v19 = vmul.f32 %v765_v22, %v594_v41  ;;  %v851_v13 = vmul.f32 %v765_v22, %v595_v54  ;;  %v534_v4 = vadd.f32 %v455_v35, %v278_v36  ;;  %v535_v51 = vadd.f32 %v455_v35, %v279_v11  ;;  %v1815_v41 = vld [vmem:[#allocation15_spill] sm:$0xff]  ;;  %v1816_v36 = vld [vmem:[#allocation14_spill] sm:$0xff] }
 0x123   :  { %v286_v54 = vmul.f32 %v1451_v44, %v1815_v41  ;;  %v288_v11 = vmul.f32 %v1451_v44, %v1816_v36  ;;  %v289_v22 = vmul.f32 %v1453_v47, %v1816_v36 }
 0x124   :  { %v889_v23 = vadd.f32 %v888_v43, %v850_v19  ;;  %v926_v17 = vadd.f32 %v925_v26, %v851_v13  ;;  %v598_v55 = vmax.f32 %v534_v4, 0.0  ;;  %v599_v28 = vmax.f32 %v535_v51, 0.0 }
 0x125   :  { %v770_v8 = vpop.permute.xlu1 %769  ;;  %v460_v25 = vpop.permute.xlu0 %459  ;;  %v287_v43 = vmul.f32 %v1453_v47, %v1815_v41 }
 0x126   :  { %v852_v40 = vmul.f32 %v770_v8, %v596_v30  ;;  %v853_v9 = vmul.f32 %v770_v8, %v597_v33  ;;  %v536_v7 = vadd.f32 %v460_v25, %v280_v49  ;;  %v537_v42 = vadd.f32 %v460_v25, %v281_v27 }
 0x128   :  { %v890_v57 = vadd.f32 %v889_v23, %v852_v40  ;;  %v927_v18 = vadd.f32 %v926_v17, %v853_v9  ;;  %v600_v32 = vmax.f32 %v536_v7, 0.0  ;;  %v601_v0 = vmax.f32 %v537_v42, 0.0 }
 0x129   :  { %v775_v61 = vpop.permute.xlu1 %774  ;;  %v465_v3 = vpop.permute.xlu0 %464 }
 0x12a   :  { %v854_v12 = vmul.f32 %v775_v61, %v598_v55  ;;  %v855_v48 = vmul.f32 %v775_v61, %v599_v28  ;;  %v538_v60 = vadd.f32 %v465_v3, %v282_v24  ;;  %v539_v63 = vadd.f32 %v465_v3, %v283_v34 }
 0x12c   :  { %v891_v2 = vadd.f32 %v890_v57, %v854_v12  ;;  %v928_v39 = vadd.f32 %v927_v18, %v855_v48  ;;  %v602_v31 = vmax.f32 %v538_v60, 0.0  ;;  %v603_v21 = vmax.f32 %v539_v63, 0.0 }
 0x12d   :  { %v780_v15 = vpop.permute.xlu1 %779  ;;  %v470_v46 = vpop.permute.xlu0 %469 }
 0x12e   :  { %v856_v38 = vmul.f32 %v780_v15, %v600_v32  ;;  %v857_v5 = vmul.f32 %v780_v15, %v601_v0  ;;  %v540_v29 = vadd.f32 %v470_v46, %v284_v45  ;;  %v541_v50 = vadd.f32 %v470_v46, %v285_v37 }
 0x12f   :  { %v941_v0 = vstv %s1749_s4  ;;  %v1031_v46 = vmov 1966171168   ;;  %s1032_s4 = smov [#allocation3]  }
 0x130   :  { %v892_v56 = vadd.f32 %v891_v2, %v856_v38  ;;  %v929_v62 = vadd.f32 %v928_v39, %v857_v5  ;;  %v604_v26 = vmax.f32 %v540_v29, 0.0  ;;  %v605_v52 = vmax.f32 %v541_v50, 0.0  ;;  %s991_s6 = sshll.u32 %s1032_s4, 4  ;;  %s992_s6 = int_to_ptr.vmem [resolvable:$true] %s991_s6 }
 0x131   :  { %v785_v20 = vpop.permute.xlu1 %784  ;;  %v475_v53 = vpop.permute.xlu0 %474  ;;  %s1008_s7 = scalar_lea.vmem %s992_s6, 32  ;;  %p1013_p1 = scmp.lt.s32.totalorder %s992_s6, %s992_s6 }
 0x132   :  { %v858_v14 = vmul.f32 %v785_v20, %v602_v31  ;;  %v859_v59 = vmul.f32 %v785_v20, %v603_v21  ;;  %v542_v19 = vadd.f32 %v475_v53, %v286_v54  ;;  %v543_v13 = vadd.f32 %v475_v53, %v287_v43  ;;  %v1817_v54 = vld [vmem:[#allocation16_spill] sm:$0xff]  ;;  %p1009_p0 = scmp.ne.s32.totalorder %s992_s6, %s1008_s7  ;;  %p1014_p2 = scmp.lt.s32.totalorder %s1008_s7, %s1008_s7 }
 0x133   :  { %v966_v31 = vunpack.c.l.s4 %v1031_v46 }
 0x134   :  { %v893_v10 = vadd.f32 %v892_v56, %v858_v14  ;;  %v930_v1 = vadd.f32 %v929_v62, %v859_v59  ;;  %v606_v16 = vmax.f32 %v542_v19, 0.0  ;;  %v607_v49 = vmax.f32 %v543_v13, 0.0  ;;  %p1015_p3 = por %p1014_p2, %p1013_p1 }
 0x135   :  { %v790_v35 = vpop.permute.xlu1 %789  ;;  %v480_v30 = vpop.permute.xlu0 %479  ;;  %v967_v56 = vunpack.c.0.s8 %v966_v31 }
 0x136   :  { %v860_v4 = vmul.f32 %v790_v35, %v604_v26  ;;  %v861_v51 = vmul.f32 %v790_v35, %v605_v52  ;;  %v544_v33 = vadd.f32 %v480_v30, %v288_v11  ;;  %v545_v23 = vadd.f32 %v480_v30, %v289_v22  ;;  %p1016_p4 = pnand %p1015_p3, %p1009_p0 }
 0x137   :  { %v970_v43 = vsub.s32 %v967_v56, %v1817_v54 }
 0x138   :  { %v894_v17 = vadd.f32 %v893_v10, %v860_v4  ;;  %v931_v8 = vadd.f32 %v930_v1, %v861_v51  ;;  %v608_v27 = vmax.f32 %v544_v33, 0.0  ;;  %v609_v40 = vmax.f32 %v545_v23, 0.0 }
 0x139   :  { %v800_v9 = vpop.permute.xlu1 %799  ;;  %v795_v25 = vpop.permute.xlu0 %794  ;;  %v1818_v1 = vlaneseq }
 0x13a   :  { %v862_v44 = vmul.f32 %v795_v25, %v606_v16  ;;  %v863_v55 = vmul.f32 %v795_v25, %v607_v49  ;;  %v864_v28 = vmul.f32 %v800_v9, %v608_v27  ;;  %v865_v47 = vmul.f32 %v800_v9, %v609_v40 }
 0x13b   :  { %vm982_vm4 = vcmp.lt.s32.totalorder %v1818_v1, 256 }
 0x13c   :  { %v895_v57 = vadd.f32 %v894_v17, %v862_v44  ;;  %v932_v18 = vadd.f32 %v931_v8, %v863_v55 }
 0x13e   :  { %v896_v7 = vadd.f32 %v895_v57, %v864_v28  ;;  %v933_v42 = vadd.f32 %v932_v18, %v865_v47 }
 0x140   :  { %v897_v58 = vrot.slane %v896_v7, 4  ;;  %v934_v24 = vrot.slane %v933_v42, 4 }
 0x142   :  { %v898_v34 = vadd.f32 %v897_v58, %v896_v7  ;;  %v935_v61 = vadd.f32 %v934_v24, %v933_v42 }
 0x144   :  { %v899_v12 = vrot.slane %v898_v34, 2  ;;  %v936_v48 = vrot.slane %v935_v61, 2 }
 0x146   :  { %v900_v3 = vadd.f32 %v899_v12, %v898_v34  ;;  %v937_v60 = vadd.f32 %v936_v48, %v935_v61 }
 0x148   :  { %v901_v63 = vrot.slane %v900_v3, 1  ;;  %v938_v32 = vrot.slane %v937_v60, 1 }
 0x14a   :  { %v902_v2 = vadd.f32 %v901_v63, %v900_v3  ;;  %v939_v39 = vadd.f32 %v938_v32, %v937_v60 }
 0x14c   :  { %v942_v15 = vadd.f32 %v941_v0, %v902_v2  ;;  %v943_v6 = vadd.f32 %v941_v0, %v939_v39 }
 0x14e   :  { %v944_v45 = vmul.f32 %v942_v15, %v942_v15  ;;  %v945_v37 = vmul.f32 %v943_v6, %v943_v6 }
 0x150   :  { %v946_v38 = vadd.f32 1e-10, %v944_v45  ;;  %v947_v5 = vadd.f32 1e-10, %v945_v37 }
 0x152   :  { %1004 = vrsqrt.f32 %v946_v38  ;;  %vm950_vm0 = vcmp.eq.f32.partialorder %v946_v38, inf  ;;  %v953_v50 = vand.u32 2147483648, %v946_v38  ;;  %vm952_vm1 = vcmp.eq.f32.partialorder %v946_v38, 0.0 }
 0x153   :  { %1006 = vrsqrt.f32 %v947_v5  ;;  %vm957_vm2 = vcmp.eq.f32.partialorder %v947_v5, inf  ;;  %v960_v59 = vand.u32 2147483648, %v947_v5  ;;  %vm959_vm3 = vcmp.eq.f32.partialorder %v947_v5, 0.0 }
 0x15f   :  { %v1005_v21 = vpop.eup %1004 }
 0x160   :  { %v1007_v62 = vpop.eup %1006  ;;  %v949_v29 = vmul.f32 %v1005_v21, %v946_v38 }
 0x161   :  { %v956_v20 = vmul.f32 %v1007_v62, %v947_v5 }
 0x162   :  { %v951_v14 = vsel %vm950_vm0, %v946_v38, %v949_v29 }
 0x163   :  { %v954_v53 = vsel %vm952_vm1, %v953_v50, %v951_v14  ;;  %v958_v41 = vsel %vm957_vm2, %v947_v5, %v956_v20 }
 0x164   :  { %v961_v26 = vsel %vm959_vm3, %v960_v59, %v958_v41 }
 0x165   :  { %v964_v52 = vcombine.low %v954_v53, %v961_v26 }
 0x167   :  { %v971_v10 = vrot.slane %v964_v52, %v970_v43 }
 0x169   :  { %v978_v36 = vrot.slane %v971_v10, %v970_v43 }
 0x16b   :  { %984 = vst.msk [vmem:[#allocation3] sm:$0x3] %vm982_vm4, %v978_v36 }
 0x16c   :  { %1019 = shalt.err (!%p1016_p4)
}
 0x16d   :  { %994 = dma.vmem_to_hbm [thread:$0]  %s992_s6, 32, %s1750_s5, [#allocation4]  }
 0x16e   :  { %1028 = dma.done.wait [#allocation4], 32  }
 0x16f   :  { %1029 = vsyncadd [#allocation4], 4294967264 }
 0x170   :  { %998 = vsyncpa [#allocation4], 1 }

</bundles_post_ra>
